<compile_context>
chip_gen: v5e
topology: v5e:2x2
jax: 0.10.0
libtpu: 0.0.40
codegen_flags: <defaults>
</compile_context>

<pallas_src>
import numpy as np

import jax
import jax.numpy as jnp
from jax.experimental import pallas as pl
from jax.experimental.pallas import tpu as pltpu

# ---------------- model configuration (matches module defaults) -------------
D_MODEL = 64
MAX_LEN = 50

# small example shapes
BATCH = 2
SEQ = 8


# ---------------- positional-encoding buffer (exactly as in PyTorch) --------
def build_pe(d_model, max_len=MAX_LEN):
    pe = np.zeros((max_len, d_model), np.float32)
    position = np.arange(0, max_len, dtype=np.float32)[:, None]
    div_term = np.exp(np.arange(0, d_model, 2, dtype=np.float32)
                      * (-np.log(10000.0) / d_model))
    pe[:, 0::2] = np.sin(position * div_term)
    pe[:, 1::2] = np.cos(position * div_term)
    return jnp.asarray(pe[None])                     # (1, max_len, d_model)


# ---------------- the Pallas kernel ------------------------------------------
def pe_add_kernel(x_ref, pe_ref, o_ref):
    # x_ref: (tb, S*D), pe_ref: (1, S*D) -> broadcast add over rows (VPU only).
    o_ref[...] = x_ref[...] + pe_ref[...]


# ---------------- wrapper -----------------------------------------------------
def positional_encoding_forward(x, pe, *, row_block=256):
    """x: (B, S, D) f32, pe: (1, MAX_LEN, D) f32  ->  x + pe[:, :S, :]."""
    B, S, D = x.shape
    R = S * D                                         # lane-dense row width

    # Contiguous (free) reshapes: last dim becomes S*D (multiple of 128 here).
    x2 = x.reshape(B, R)
    pe2 = pe[:, :S, :].reshape(1, R)

    # Row-blocked grid: big batches shard across cores; tiny batches -> 1 step.
    tb = row_block if (B % row_block == 0) else B
    grid = (B // tb,)

    out = pl.pallas_call(
        pe_add_kernel,
        out_shape=jax.ShapeDtypeStruct((B, R), x.dtype),
        grid_spec=pltpu.PrefetchScalarGridSpec(
            num_scalar_prefetch=0,
            grid=grid,
            in_specs=[
                pl.BlockSpec((tb, R), lambda i: (i, 0)),   # x row block
                pl.BlockSpec((1, R), lambda i: (0, 0)),    # pe, resident
            ],
            out_specs=pl.BlockSpec((tb, R), lambda i: (i, 0)),
        ),
        compiler_params=pltpu.CompilerParams(
            dimension_semantics=("parallel",),
            vmem_limit_bytes=16 * 1024 * 1024,
        ),
    )(x2, pe2)

    return out.reshape(B, S, D)


# ---------------- main --------------------------------------------------------
if __name__ == "__main__":
    key = jax.random.PRNGKey(0)

    pe = build_pe(D_MODEL, MAX_LEN)                                 # (1, 50, 64)
    x = jax.random.normal(key, (BATCH, SEQ, D_MODEL), jnp.float32)  # (2, 8, 64)

    out = positional_encoding_forward(x, pe)
    jax.block_until_ready(out)

    assert out.shape == (BATCH, SEQ, D_MODEL)

    # reference check: identical op in plain JAX (exact f32 add)
    ref = x + pe[:, :SEQ, :]
    np.testing.assert_allclose(np.asarray(out), np.asarray(ref), rtol=0, atol=0)

    print("KERNEL_OK")
</pallas_src>

<mosaic_0001>
module attributes {stable_mosaic.version = 11 : i64} {
  func.func @pe_add_kernel(%arg0: i32, %arg1: memref<2x512xf32, #tpu.memory_space<vmem>>, %arg2: memref<1x512xf32, #tpu.memory_space<vmem>>, %arg3: memref<2x512xf32, #tpu.memory_space<vmem>>) attributes {dimension_semantics = [#tpu.dimension_semantics<parallel>], iteration_bounds = array<i64: 1>, scalar_prefetch = 0 : i64, scratch_operands = 0 : i64, tpu.core_type = #tpu.core_type<tc>, window_params = [{transform_indices = @transform_0, window_bounds = array<i64: 2, 512>}, {pipeline_mode = #tpu.pipeline_mode<synchronous>, transform_indices = @transform_1, window_bounds = array<i64: 1, 512>}, {transform_indices = @transform_2, window_bounds = array<i64: 2, 512>}]} {
    %c0 = arith.constant 0 : index
    %c0_0 = arith.constant 0 : index
    %0 = vector.load %arg1[%c0, %c0_0] : memref<2x512xf32, #tpu.memory_space<vmem>>, vector<2x512xf32>
    %c0_1 = arith.constant 0 : index
    %c0_2 = arith.constant 0 : index
    %1 = vector.load %arg2[%c0_1, %c0_2] : memref<1x512xf32, #tpu.memory_space<vmem>>, vector<1x512xf32>
    %2 = vector.broadcast %1 : vector<1x512xf32> to vector<2x512xf32>
    %3 = arith.addf %0, %2 : vector<2x512xf32>
    %c0_3 = arith.constant 0 : index
    %c0_4 = arith.constant 0 : index
    %4 = vector.load %arg3[%c0_3, %c0_4] : memref<2x512xf32, #tpu.memory_space<vmem>>, vector<2x512xf32>
    tpu.vector_store %arg3[%c0_3, %c0_4], %3 {strides = array<i32>} : memref<2x512xf32, #tpu.memory_space<vmem>>, vector<2x512xf32>,
    return
  }
  func.func @transform_0(%arg0: i32) -> (i32, i32) {
    %c0_i32 = arith.constant 0 : i32
    %c0_i32_0 = arith.constant 0 : i32
    return %arg0, %c0_i32 : i32, i32
  }
  func.func @transform_1(%arg0: i32) -> (i32, i32) {
    %c0_i32 = arith.constant 0 : i32
    %c0_i32_0 = arith.constant 0 : i32
    %c0_i32_1 = arith.constant 0 : i32
    return %c0_i32, %c0_i32_0 : i32, i32
  }
  func.func @transform_2(%arg0: i32) -> (i32, i32) {
    %c0_i32 = arith.constant 0 : i32
    %c0_i32_0 = arith.constant 0 : i32
    return %arg0, %c0_i32 : i32, i32
  }
}

</mosaic_0001>

<bundles_post_ra>
// kernel: tpu_custom_call.1
= control target key start
LH: loop header
LB: loop body
LE: loop exit
PB: predicated region body
PF: predicated region fallthrough
CT: control target
= control target key end

     0   :  { %7 = vsyncpa [#allocation3], 0  ;;  %s185_s0 = inlined_call_operand.hbm [shape: f32[2,512], index: 0, kind: input, shape index: {}]   ;;  %s186_s1 = inlined_call_operand.hbm [shape: f32[1,512], index: 1, kind: input, shape index: {}]   ;;  %s187_s2 = inlined_call_operand.hbm [shape: f32[2,512], index: 2, kind: output, shape index: {}]  }
   0x1   :  { %8 = vsyncpa [#allocation6], 0 }
   0x2   :  { %9 = vsyncpa [#allocation4], 0  ;;  %s15_s11 = sshll.u32 %s185_s0, 4  ;;  %s158_s12 = smov [#allocation2]   ;;  %s16_s11 = int_to_ptr.hbm [resolvable:$true] %s15_s11 }
   0x3   :  { %s17_s13 = sshll.u32 %s158_s12, 4  ;;  %s26_s16 = sshll.u32 %s186_s1, 4  ;;  %s18_s13 = int_to_ptr.vmem [resolvable:$true] %s17_s13  ;;  %s27_s16 = int_to_ptr.hbm [resolvable:$true] %s26_s16 }
   0x4   :  { %20 = dma.hbm_to_vmem [thread:$0]  %s16_s11, 128, %s18_s13, [#allocation3]  }
   0x5   :  { %s159_s17 = smov [#allocation5]  }
   0x6   :  { %s28_s18 = sshll.u32 %s159_s17, 4  ;;  %s29_s18 = int_to_ptr.vmem [resolvable:$true] %s28_s18 }
   0x7   :  { %31 = dma.hbm_to_vmem [thread:$0]  %s27_s16, 64, %s29_s18, [#allocation6]  }
   0x8   :  { %152 = dma.done.wait [#allocation3], 128  }
   0x9   :  { %153 = vsyncadd [#allocation3], 4294967168 }
   0xa   :  { %154 = dma.done.wait [#allocation6], 64  }
   0xb   :  { %155 = vsyncadd [#allocation6], 4294967232  ;;  %v41_v0 = vld [vmem:[#allocation5] sm:$0xf]  ;;  %vm50_vm0 = vcmask 1041408   ;;  %vm52_vm1 = vcmask 1045508  }
   0xc   :  { %v43_v1 = vperm.slane %v41_v0, 0  ;;  %v44_v2 = vperm.slane %v41_v0, 1  ;;  %v45_v3 = vperm.slane %v41_v0, 2  ;;  %v46_v4 = vperm.slane %v41_v0, 3  ;;  %v40_v8 = vld [vmem:[#allocation2] sm:$0xff]  ;;  %s160_s0 = smov [#allocation7]  }
   0xd   :  { %vm54_vm2 = vcmask 1043456   ;;  %s64_s1 = sshll.u32 %s160_s0, 4  ;;  %s66_s21 = sshll.u32 %s187_s2, 4  ;;  %s65_s1 = int_to_ptr.vmem [resolvable:$true] %s64_s1  ;;  %s67_s21 = int_to_ptr.hbm [resolvable:$true] %s66_s21 }
   0xe   :  { %v47_v5 = vrot.slane %v44_v2, 6  ;;  %v48_v6 = vrot.slane %v45_v3, 4  ;;  %v49_v7 = vrot.slane %v46_v4, 2 }
  0x10   :  { %v51_v9 = vsel %vm50_vm0, %v43_v1, %v47_v5  ;;  %v53_v10 = vsel %vm52_vm1, %v48_v6, %v49_v7 }
  0x11   :  { %v55_v11 = vsel %vm54_vm2, %v51_v9, %v53_v10 }
  0x12   :  { %v57_v12 = vadd.f32 %v55_v11, %v40_v8 }
  0x14   :  { %58 = vst [vmem:[#allocation7] sm:$0xff] %v57_v12 }
  0x15   :  { %69 = dma.vmem_to_hbm [thread:$0]  %s65_s1, 128, %s67_s21, [#allocation4]  }
  0x16   :  { %156 = dma.done.wait [#allocation4], 128  }
  0x17   :  { %157 = vsyncadd [#allocation4], 4294967168 }
  0x18   :  { %74 = vsyncpa [#allocation3], 1 }
  0x19   :  { %75 = vsyncpa [#allocation6], 1 }
  0x1a   :  { %76 = vsyncpa [#allocation4], 1 }

</bundles_post_ra>
